<compile_context>
chip_gen: v6e
topology: v6e:2x2x1
jax: 0.10.0
libtpu: 0.0.40
codegen_flags: <defaults>
</compile_context>

<pallas_src>
import jax
import jax.numpy as jnp
from jax.experimental import pallas as pl
from jax.experimental.pallas import tpu as pltpu

HIDDEN = 128
MAX_BATCH_TILE = 512  # rows per grid step; small VMEM footprint even double-buffered


def _mlp_kernel(x_ref, w1_ref, b1_ref, w2_ref, b2_ref, w3_ref, b3_ref, o_ref):
    # All refs are f32 VMEM tiles. Matmul operands are cast to bf16 in-kernel so
    # HBM only ever sees a single f32 pass per tensor; accumulation stays f32.
    x = x_ref[...].astype(jnp.bfloat16)                                 # (TB, D_in)

    # Layer 1: Linear(D_in -> 128) + ReLU
    h1 = jnp.dot(x, w1_ref[...].astype(jnp.bfloat16),
                 preferred_element_type=jnp.float32)
    h1 = jnp.maximum(h1 + b1_ref[...], 0.0)                             # (TB, 128) f32

    # Layer 2: Linear(128 -> 128) + ReLU
    h2 = jnp.dot(h1.astype(jnp.bfloat16), w2_ref[...].astype(jnp.bfloat16),
                 preferred_element_type=jnp.float32)
    h2 = jnp.maximum(h2 + b2_ref[...], 0.0)                             # (TB, 128) f32

    # Layer 3: Linear(128 -> D_out), no activation
    out = jnp.dot(h2.astype(jnp.bfloat16), w3_ref[...].astype(jnp.bfloat16),
                  preferred_element_type=jnp.float32)
    o_ref[...] = (out + b3_ref[...]).astype(o_ref.dtype)                # (TB, D_out)


def qtran_qnetwork_forward(x, params):
    """QTRANQNetwork MLP forward in a single batch-tiled Pallas kernel.

    x: (batch, input_size) float32
    params: dict with w1 (in,128), b1 (1,128), w2 (128,128), b2 (1,128),
            w3 (128,out), b3 (1,out)   (all float32)
    Returns (batch, output_size) float32.
    """
    w1, b1 = params["w1"], params["b1"]
    w2, b2 = params["w2"], params["b2"]
    w3, b3 = params["w3"], params["b3"]

    batch, d_in = x.shape
    d_out = w3.shape[1]

    # Batch tile: whole batch when small (block dim == full array dim is always
    # legal); otherwise a sublane-aligned 512-row tile. A ragged final block is
    # masked by Pallas (OOB reads unused, OOB writes dropped).
    tb = batch if batch <= MAX_BATCH_TILE else MAX_BATCH_TILE
    n_tiles = pl.cdiv(batch, tb)

    # Weights/biases resident across grid steps: constant index_map, full-array block.
    def resident(a):
        nd = a.ndim
        return pl.BlockSpec(a.shape, lambda i, _n=nd: (0,) * _n)

    flops = 2 * batch * (d_in * HIDDEN + HIDDEN * HIDDEN + HIDDEN * d_out)
    bytes_accessed = 4 * (x.size + w1.size + b1.size + w2.size + b2.size
                          + w3.size + b3.size + batch * d_out)

    return pl.pallas_call(
        _mlp_kernel,
        out_shape=jax.ShapeDtypeStruct((batch, d_out), jnp.float32),
        grid=(n_tiles,),
        in_specs=[
            pl.BlockSpec((tb, d_in), lambda i: (i, 0)),   # x: batch-tiled
            resident(w1), resident(b1),
            resident(w2), resident(b2),
            resident(w3), resident(b3),
        ],
        out_specs=pl.BlockSpec((tb, d_out), lambda i: (i, 0)),
        compiler_params=pltpu.CompilerParams(
            dimension_semantics=("parallel",)),
        cost_estimate=pl.CostEstimate(
            flops=flops, transcendentals=0, bytes_accessed=bytes_accessed),
    )(x, w1, b1, w2, b2, w3, b3)


def init_params(key, input_size, output_size):
    """Deterministic synthetic parameter init (PyTorch-like uniform fan-in)."""
    ks = jax.random.split(key, 6)

    def lin(kw, kb, fan_in, fan_out):
        bound = 1.0 / jnp.sqrt(fan_in)
        w = jax.random.uniform(kw, (fan_in, fan_out), jnp.float32, -bound, bound)
        b = jax.random.uniform(kb, (1, fan_out), jnp.float32, -bound, bound)
        return w, b

    w1, b1 = lin(ks[0], ks[1], input_size, HIDDEN)
    w2, b2 = lin(ks[2], ks[3], HIDDEN, HIDDEN)
    w3, b3 = lin(ks[4], ks[5], HIDDEN, output_size)
    return {"w1": w1, "b1": b1, "w2": w2, "b2": b2, "w3": w3, "b3": b3}


def reference_forward(x, params):
    h1 = jnp.maximum(x @ params["w1"] + params["b1"], 0.0)
    h2 = jnp.maximum(h1 @ params["w2"] + params["b2"], 0.0)
    return h2 @ params["w3"] + params["b3"]


if __name__ == "__main__":
    input_size = 32     # number of input features
    output_size = 8     # number of actions / outputs
    batch = 10          # deliberately not a multiple of 8 — exercises non-aligned path

    key = jax.random.PRNGKey(0)
    kx, kp = jax.random.split(key)

    x = jax.random.normal(kx, (batch, input_size), dtype=jnp.float32)
    params = init_params(kp, input_size, output_size)

    out = jax.block_until_ready(qtran_qnetwork_forward(x, params))

    ref = reference_forward(x, params)
    assert out.shape == (batch, output_size)
    # bf16 matmul operands with f32 accumulation: loosen tolerance accordingly.
    assert jnp.allclose(out, ref, atol=5e-2, rtol=5e-2), "mismatch vs reference"

    print("KERNEL_OK")
</pallas_src>

<mosaic_0001>
module attributes {stable_mosaic.version = 11 : i64} {
  func.func @_mlp_kernel(%arg0: i32, %arg1: memref<10x32xf32, #tpu.memory_space<vmem>>, %arg2: memref<32x128xf32, #tpu.memory_space<vmem>>, %arg3: memref<1x128xf32, #tpu.memory_space<vmem>>, %arg4: memref<128x128xf32, #tpu.memory_space<vmem>>, %arg5: memref<1x128xf32, #tpu.memory_space<vmem>>, %arg6: memref<128x8xf32, #tpu.memory_space<vmem>>, %arg7: memref<1x8xf32, #tpu.memory_space<vmem>>, %arg8: memref<10x8xf32, #tpu.memory_space<vmem>>) attributes {dimension_semantics = [#tpu.dimension_semantics<parallel>], iteration_bounds = array<i64: 1>, scalar_prefetch = 0 : i64, scratch_operands = 0 : i64, tpu.core_type = #tpu.core_type<tc>, window_params = [{transform_indices = @transform_0, window_bounds = array<i64: 10, 32>}, {pipeline_mode = #tpu.pipeline_mode<synchronous>, transform_indices = @transform_1, window_bounds = array<i64: 32, 128>}, {pipeline_mode = #tpu.pipeline_mode<synchronous>, transform_indices = @transform_2, window_bounds = array<i64: 1, 128>}, {pipeline_mode = #tpu.pipeline_mode<synchronous>, transform_indices = @transform_3, window_bounds = array<i64: 128, 128>}, {pipeline_mode = #tpu.pipeline_mode<synchronous>, transform_indices = @transform_4, window_bounds = array<i64: 1, 128>}, {pipeline_mode = #tpu.pipeline_mode<synchronous>, transform_indices = @transform_5, window_bounds = array<i64: 128, 8>}, {pipeline_mode = #tpu.pipeline_mode<synchronous>, transform_indices = @transform_6, window_bounds = array<i64: 1, 8>}, {transform_indices = @transform_7, window_bounds = array<i64: 10, 8>}]} {
    %c0 = arith.constant 0 : index
    %c0_0 = arith.constant 0 : index
    %0 = vector.load %arg1[%c0, %c0_0] : memref<10x32xf32, #tpu.memory_space<vmem>>, vector<10x32xf32>
    %1 = arith.truncf %0 : vector<10x32xf32> to vector<10x32xbf16>
    %c0_1 = arith.constant 0 : index
    %c0_2 = arith.constant 0 : index
    %2 = vector.load %arg2[%c0_1, %c0_2] : memref<32x128xf32, #tpu.memory_space<vmem>>, vector<32x128xf32>
    %3 = arith.truncf %2 : vector<32x128xf32> to vector<32x128xbf16>
    %cst = arith.constant dense<0.000000e+00> : vector<10x128xf32>
    %4 = tpu.matmul %1, %3, %cst {dimension_numbers = #tpu.dot_dimension_numbers<[1], [0], [0], [1], [0, 0, 1, 1], [], []>} : vector<10x32xbf16>, vector<32x128xbf16>, vector<10x128xf32> -> vector<10x128xf32>
    %c0_3 = arith.constant 0 : index
    %c0_4 = arith.constant 0 : index
    %5 = vector.load %arg3[%c0_3, %c0_4] : memref<1x128xf32, #tpu.memory_space<vmem>>, vector<1x128xf32>
    %6 = vector.broadcast %5 : vector<1x128xf32> to vector<10x128xf32>
    %7 = arith.addf %4, %6 : vector<10x128xf32>
    %cst_5 = arith.constant 0.000000e+00 : f32
    %8 = vector.broadcast %cst_5 : f32 to vector<10x128xf32>
    %9 = arith.maximumf %7, %8 : vector<10x128xf32>
    %10 = arith.truncf %9 : vector<10x128xf32> to vector<10x128xbf16>
    %c0_6 = arith.constant 0 : index
    %c0_7 = arith.constant 0 : index
    %11 = vector.load %arg4[%c0_6, %c0_7] : memref<128x128xf32, #tpu.memory_space<vmem>>, vector<128x128xf32>
    %12 = arith.truncf %11 : vector<128x128xf32> to vector<128x128xbf16>
    %cst_8 = arith.constant dense<0.000000e+00> : vector<10x128xf32>
    %13 = tpu.matmul %10, %12, %cst_8 {dimension_numbers = #tpu.dot_dimension_numbers<[1], [0], [0], [1], [0, 0, 1, 1], [], []>} : vector<10x128xbf16>, vector<128x128xbf16>, vector<10x128xf32> -> vector<10x128xf32>
    %c0_9 = arith.constant 0 : index
    %c0_10 = arith.constant 0 : index
    %14 = vector.load %arg5[%c0_9, %c0_10] : memref<1x128xf32, #tpu.memory_space<vmem>>, vector<1x128xf32>
    %15 = vector.broadcast %14 : vector<1x128xf32> to vector<10x128xf32>
    %16 = arith.addf %13, %15 : vector<10x128xf32>
    %cst_11 = arith.constant 0.000000e+00 : f32
    %17 = vector.broadcast %cst_11 : f32 to vector<10x128xf32>
    %18 = arith.maximumf %16, %17 : vector<10x128xf32>
    %19 = arith.truncf %18 : vector<10x128xf32> to vector<10x128xbf16>
    %c0_12 = arith.constant 0 : index
    %c0_13 = arith.constant 0 : index
    %20 = vector.load %arg6[%c0_12, %c0_13] : memref<128x8xf32, #tpu.memory_space<vmem>>, vector<128x8xf32>
    %21 = arith.truncf %20 : vector<128x8xf32> to vector<128x8xbf16>
    %cst_14 = arith.constant dense<0.000000e+00> : vector<10x8xf32>
    %22 = tpu.matmul %19, %21, %cst_14 {dimension_numbers = #tpu.dot_dimension_numbers<[1], [0], [0], [1], [0, 0, 1, 1], [], []>} : vector<10x128xbf16>, vector<128x8xbf16>, vector<10x8xf32> -> vector<10x8xf32>
    %c0_15 = arith.constant 0 : index
    %c0_16 = arith.constant 0 : index
    %23 = vector.load %arg7[%c0_15, %c0_16] : memref<1x8xf32, #tpu.memory_space<vmem>>, vector<1x8xf32>
    %24 = vector.broadcast %23 : vector<1x8xf32> to vector<10x8xf32>
    %25 = arith.addf %22, %24 : vector<10x8xf32>
    %c0_17 = arith.constant 0 : index
    %c0_18 = arith.constant 0 : index
    %26 = vector.load %arg8[%c0_17, %c0_18] : memref<10x8xf32, #tpu.memory_space<vmem>>, vector<10x8xf32>
    tpu.vector_store %arg8[%c0_17, %c0_18], %25 {strides = array<i32>} : memref<10x8xf32, #tpu.memory_space<vmem>>, vector<10x8xf32>,
    return
  }
  func.func @transform_0(%arg0: i32) -> (i32, i32) {
    %c0_i32 = arith.constant 0 : i32
    %c0_i32_0 = arith.constant 0 : i32
    return %arg0, %c0_i32 : i32, i32
  }
  func.func @transform_1(%arg0: i32) -> (i32, i32) {
    %c0_i32 = arith.constant 0 : i32
    %c0_i32_0 = arith.constant 0 : i32
    %c0_i32_1 = arith.constant 0 : i32
    return %c0_i32, %c0_i32_0 : i32, i32
  }
  func.func @transform_2(%arg0: i32) -> (i32, i32) {
    %c0_i32 = arith.constant 0 : i32
    %c0_i32_0 = arith.constant 0 : i32
    %c0_i32_1 = arith.constant 0 : i32
    return %c0_i32, %c0_i32_0 : i32, i32
  }
  func.func @transform_3(%arg0: i32) -> (i32, i32) {
    %c0_i32 = arith.constant 0 : i32
    %c0_i32_0 = arith.constant 0 : i32
    %c0_i32_1 = arith.constant 0 : i32
    return %c0_i32, %c0_i32_0 : i32, i32
  }
  func.func @transform_4(%arg0: i32) -> (i32, i32) {
    %c0_i32 = arith.constant 0 : i32
    %c0_i32_0 = arith.constant 0 : i32
    %c0_i32_1 = arith.constant 0 : i32
    return %c0_i32, %c0_i32_0 : i32, i32
  }
  func.func @transform_5(%arg0: i32) -> (i32, i32) {
    %c0_i32 = arith.constant 0 : i32
    %c0_i32_0 = arith.constant 0 : i32
    %c0_i32_1 = arith.constant 0 : i32
    return %c0_i32, %c0_i32_0 : i32, i32
  }
  func.func @transform_6(%arg0: i32) -> (i32, i32) {
    %c0_i32 = arith.constant 0 : i32
    %c0_i32_0 = arith.constant 0 : i32
    %c0_i32_1 = arith.constant 0 : i32
    return %c0_i32, %c0_i32_0 : i32, i32
  }
  func.func @transform_7(%arg0: i32) -> (i32, i32) {
    %c0_i32 = arith.constant 0 : i32
    %c0_i32_0 = arith.constant 0 : i32
    return %arg0, %c0_i32 : i32, i32
  }
}

</mosaic_0001>

<bundles_post_ra>
// kernel: tpu_custom_call.1
= control target key start
LH: loop header
LB: loop body
LE: loop exit
PB: predicated region body
PF: predicated region fallthrough
CT: control target
= control target key end

     0   :  { %12 = vsyncpa [#allocation3], 0  ;;  %s586_s0 = inlined_call_operand.hbm [shape: f32[10,32], index: 0, kind: input, shape index: {}]   ;;  %s587_s1 = inlined_call_operand.hbm [shape: f32[32,128], index: 1, kind: input, shape index: {}]   ;;  %s588_s2 = inlined_call_operand.vmem [shape: f32[1,128], index: 2, kind: input, shape index: {}]   ;;  %s589_s3 = inlined_call_operand.vmem [shape: f32[128,128], index: 3, kind: input, shape index: {}]   ;;  %s590_s4 = inlined_call_operand.vmem [shape: f32[1,128], index: 4, kind: input, shape index: {}]   ;;  %s591_s5 = inlined_call_operand.vmem [shape: f32[128,8], index: 5, kind: input, shape index: {}]   ;;  %s592_s6 = inlined_call_operand.vmem [shape: f32[1,8], index: 6, kind: input, shape index: {}]   ;;  %s593_s7 = inlined_call_operand.vmem [shape: f32[10,8], index: 7, kind: output, shape index: {}]  }
   0x1   :  { %13 = vsyncpa [#allocation5], 0  ;;  %s399_s24 = smov [#allocation2]  }
   0x2   :  { %s19_s25 = sshll.u32 %s399_s24, 4  ;;  %s20_s25 = int_to_ptr.vmem [resolvable:$true] %s19_s25 }
   0x3   :  { %s363_s26 = scalar_lea.vmem %s20_s25, 256  ;;  %p368_p1 = scmp.lt.s32.totalorder %s20_s25, %s20_s25 }
   0x4   :  { %p364_p0 = scmp.ne.s32.totalorder %s20_s25, %s363_s26  ;;  %p369_p2 = scmp.lt.s32.totalorder %s363_s26, %s363_s26 }
   0x6   :  { %p370_p3 = por %p369_p2, %p368_p1 }
   0x8   :  { %p371_p4 = pnand %p370_p3, %p364_p0 }
   0xa   :  { %374 = shalt.err (!%p371_p4)
}
   0xb   :  { %s400_s27 = smov 128   ;;  %s401_s28 = smov 8  }
   0xc   :  { %25 = dma.hbm_to_vmem [thread:$0]  %s586_s0, 256, %s20_s25, [#allocation3], %s400_s27, %s400_s27, %s401_s28  }
   0xd   :  { %s402_s8 = smov [#allocation4]  }
   0xe   :  { %s31_s9 = sshll.u32 %s402_s8, 4  ;;  %s32_s9 = int_to_ptr.vmem [resolvable:$true] %s31_s9 }
   0xf   :  { %s383_s10 = scalar_lea.vmem %s32_s9, 512  ;;  %p388_p6 = scmp.lt.s32.totalorder %s32_s9, %s32_s9 }
  0x10   :  { %p384_p5 = scmp.ne.s32.totalorder %s32_s9, %s383_s10  ;;  %p389_p7 = scmp.lt.s32.totalorder %s383_s10, %s383_s10 }
  0x12   :  { %p390_p8 = por %p389_p7, %p388_p6 }
  0x14   :  { %p391_p9 = pnand %p390_p8, %p384_p5 }
  0x16   :  { %394 = shalt.err (!%p391_p9)
}
  0x17   :  { %37 = dma.hbm_to_vmem [thread:$0]  %s587_s1, 512, %s32_s9, [#allocation5], %s400_s27, %s400_s27, %s401_s28  }
  0x18   :  { %395 = dma.done.wait [#allocation3], 256  }
  0x19   :  { %396 = vsyncadd [#allocation3], 4294967040 }
  0x1a   :  { %397 = dma.done.wait [#allocation5], 512  }
  0x1b   :  { %398 = vsyncadd [#allocation5], 4294966784  ;;  %v403_v0 = vmov 0.0   ;;  %vm404_vm0 = vmmov 0   ;;  %v60_v1 = vld [vmem:[#allocation4 + $0x10] sm:$0xff]  ;;  %v61_v2 = vld [vmem:[#allocation4 + $0x18] sm:$0xff] }
  0x1c   :  { %301 = vmatprep.subr.bf16.mxu0 %v403_v0  ;;  %305 = vmatprep.mubr.msk.bf16.mxu0 %vm404_vm0, %v403_v0  ;;  %v58_v3 = vld [vmem:[#allocation4] sm:$0xff]  ;;  %v63_v4 = vpack.c.bf16 %v61_v2, %v60_v1  ;;  %v59_v5 = vld [vmem:[#allocation4 + $0x8] sm:$0xff]  ;;  %v131_v8 = vld [vmem:[%s589_s3 + $0x60] sm:$0xff]  ;;  %vm71_vm1 = vcmask 261120   ;;  %vm266_vm2 = vcmask 64512   ;;  %vm268_vm3 = vcmask 58368  }
  0x1d   :  { %309 = vmatprep.subr.bf16.mxu1 %v403_v0  ;;  %325 = vmatprep.mubr.msk.bf16.mxu1 %vm404_vm0, %v403_v0  ;;  %v133_v6 = vld [vmem:[%s589_s3 + $0x70] sm:$0xff]  ;;  %v134_v7 = vld [vmem:[%s589_s3 + $0x78] sm:$0xff]  ;;  %v62_v9 = vpack.c.bf16 %v59_v5, %v58_v3  ;;  %v55_v10 = vld [vmem:[#allocation2] sm:$0xff] }
  0x1e   :  { %302 = vmatpush3.bf16.msra.mxu0 %v63_v4  ;;  %v56_v11 = vld [vmem:[#allocation2 + $0x8] sm:$0x3]  ;;  %v142_v12 = vpack.c.bf16 %v134_v7, %v133_v6  ;;  %v129_v16 = vld [vmem:[%s589_s3 + $0x50] sm:$0xff]  ;;  %v130_v17 = vld [vmem:[%s589_s3 + $0x58] sm:$0xff] }
  0x1f   :  { %v132_v13 = vld [vmem:[%s589_s3 + $0x68] sm:$0xff]  ;;  %303 = vmatprep.subr.bf16.mxu0 %v403_v0  ;;  %v57_v15 = vpack.c.bf16 %v56_v11, %v55_v10  ;;  %v140_v18 = vpack.c.bf16 %v130_v17, %v129_v16  ;;  %v127_v19 = vld [vmem:[%s589_s3 + $0x40] sm:$0xff]  ;;  %v125_v22 = vld [vmem:[%s589_s3 + $0x30] sm:$0xff] }
  0x20   :  { %310 = vmatpush3.bf16.msra.mxu1 %v142_v12  ;;  %v141_v14 = vpack.c.bf16 %v132_v13, %v131_v8  ;;  %v128_v20 = vld [vmem:[%s589_s3 + $0x48] sm:$0xff]  ;;  %v126_v23 = vld [vmem:[%s589_s3 + $0x38] sm:$0xff]  ;;  %v123_v25 = vld [vmem:[%s589_s3 + $0x20] sm:$0xff] }
  0x21   :  { %311 = vmatprep.subr.bf16.mxu1 %v403_v0  ;;  %v139_v21 = vpack.c.bf16 %v128_v20, %v127_v19  ;;  %v138_v24 = vpack.c.bf16 %v126_v23, %v125_v22  ;;  %v124_v26 = vld [vmem:[%s589_s3 + $0x28] sm:$0xff]  ;;  %v121_v28 = vld [vmem:[%s589_s3 + $0x10] sm:$0xff]  ;;  %v122_v29 = vld [vmem:[%s589_s3 + $0x18] sm:$0xff] }
  0x22   :  { %304 = vmatpush3.bf16.msra.mxu0 %v62_v9  ;;  %v137_v27 = vpack.c.bf16 %v124_v26, %v123_v25  ;;  %v136_v30 = vpack.c.bf16 %v122_v29, %v121_v28  ;;  %v119_v31 = vld [vmem:[%s589_s3] sm:$0xff]  ;;  %v120_v32 = vld [vmem:[%s589_s3 + $0x8] sm:$0xff]  ;;  %v208_v34 = vld [vmem:[%s591_s5 + $0x70] sm:$0xff] }
  0x23   :  { %329 = vmatprep.subr.bf16.mxu0 %v403_v0  ;;  %v135_v33 = vpack.c.bf16 %v120_v32, %v119_v31  ;;  %v209_v35 = vld [vmem:[%s591_s5 + $0x78] sm:$0xff]  ;;  %v206_v36 = vld [vmem:[%s591_s5 + $0x60] sm:$0xff]  ;;  %v207_v38 = vld [vmem:[%s591_s5 + $0x68] sm:$0xff] }
  0x24   :  { %312 = vmatpush3.bf16.msra.mxu1 %v141_v14  ;;  %v217_v37 = vpack.c.bf16 %v209_v35, %v208_v34  ;;  %v216_v39 = vpack.c.bf16 %v207_v38, %v206_v36  ;;  %v204_v40 = vld [vmem:[%s591_s5 + $0x50] sm:$0xff]  ;;  %v205_v41 = vld [vmem:[%s591_s5 + $0x58] sm:$0xff]  ;;  %v202_v43 = vld [vmem:[%s591_s5 + $0x40] sm:$0xff] }
  0x25   :  { %306 = vmatmul.mubr.msk.bf16.vlgmr.msra.gmra.mxu0 %vm71_vm1, %v57_v15  ;;  %313 = vmatprep.subr.bf16.mxu1 %v403_v0  ;;  %v215_v42 = vpack.c.bf16 %v205_v41, %v204_v40  ;;  %v203_v44 = vld [vmem:[%s591_s5 + $0x48] sm:$0xff]  ;;  %v200_v46 = vld [vmem:[%s591_s5 + $0x30] sm:$0xff]  ;;  %v201_v47 = vld [vmem:[%s591_s5 + $0x38] sm:$0xff] }
  0x26   :  { %345 = vmatprep.mubr.msk.bf16.mxu0 %vm404_vm0, %v403_v0  ;;  %330 = vmatpush3.bf16.msra.mxu0 %v217_v37  ;;  %v214_v45 = vpack.c.bf16 %v203_v44, %v202_v43  ;;  %v213_v48 = vpack.c.bf16 %v201_v47, %v200_v46  ;;  %v276_v49 = vld [vmem:[%s588_s2] ss:$0 sm:$0xff]  ;;  %v199_v60 = vld [vmem:[%s591_s5 + $0x28] sm:$0xff]  ;;  %v196_v62 = vld [vmem:[%s591_s5 + $0x10] sm:$0xff] }
  0x27   :  { %331 = vmatprep.subr.bf16.mxu0 %v403_v0  ;;  %v198_v59 = vld [vmem:[%s591_s5 + $0x20] sm:$0xff]  ;;  %v197_v63 = vld [vmem:[%s591_s5 + $0x18] sm:$0xff]  ;;  %v195_v3 = vld [vmem:[%s591_s5 + $0x8] sm:$0xff] }
  0x28   :  { %314 = vmatpush3.bf16.msra.mxu1 %v140_v18  ;;  %v212_v61 = vpack.c.bf16 %v199_v60, %v198_v59  ;;  %v211_v1 = vpack.c.bf16 %v197_v63, %v196_v62  ;;  %v194_v2 = vld [vmem:[%s591_s5] sm:$0xff] }
  0x29   :  { %315 = vmatprep.subr.bf16.mxu1 %v403_v0  ;;  %v210_v4 = vpack.c.bf16 %v195_v3, %v194_v2  ;;  %v278_v5 = vld [vmem:[%s590_s4] ss:$0 sm:$0xff] }
  0x2a   :  { %332 = vmatpush3.bf16.msra.mxu0 %v216_v39  ;;  %v279_v14 = vld [vmem:[%s592_s6] ss:$0 sm:$0xff] }
  0x2b   :  { %333 = vmatprep.subr.bf16.mxu0 %v403_v0 }
  0x2c   :  { %316 = vmatpush3.bf16.msra.mxu1 %v139_v21 }
  0x2d   :  { %317 = vmatprep.subr.bf16.mxu1 %v403_v0 }
  0x2e   :  { %334 = vmatpush3.bf16.msra.mxu0 %v215_v42 }
  0x2f   :  { %335 = vmatprep.subr.bf16.mxu0 %v403_v0 }
  0x30   :  { %318 = vmatpush3.bf16.msra.mxu1 %v138_v24 }
  0x31   :  { %319 = vmatprep.subr.bf16.mxu1 %v403_v0 }
  0x32   :  { %336 = vmatpush3.bf16.msra.mxu0 %v214_v45 }
  0x33   :  { %337 = vmatprep.subr.bf16.mxu0 %v403_v0 }
  0x34   :  { %320 = vmatpush3.bf16.msra.mxu1 %v137_v27 }
  0x35   :  { %321 = vmatprep.subr.bf16.mxu1 %v403_v0 }
  0x36   :  { %338 = vmatpush3.bf16.msra.mxu0 %v213_v48 }
  0x37   :  { %339 = vmatprep.subr.bf16.mxu0 %v403_v0 }
  0x38   :  { %322 = vmatpush3.bf16.msra.mxu1 %v136_v30 }
  0x39   :  { %323 = vmatprep.subr.bf16.mxu1 %v403_v0 }
  0x3a   :  { %340 = vmatpush3.bf16.msra.mxu0 %v212_v61 }
  0x3b   :  { %341 = vmatprep.subr.bf16.mxu0 %v403_v0 }
  0x3c   :  { %324 = vmatpush3.bf16.msra.mxu1 %v135_v33 }
  0x3e   :  { %342 = vmatpush3.bf16.msra.mxu0 %v211_v1 }
  0x3f   :  { %343 = vmatprep.subr.bf16.mxu0 %v403_v0 }
  0x42   :  { %344 = vmatpush3.bf16.msra.mxu0 %v210_v4 }
  0xe5   :  { %v109_v50 = vpop.f32.mrf.mxu0 }
  0xe6   :  { %v110_v52 = vadd.f32 %v276_v49, %v109_v50 }
  0xe7   :  { %v307_v51 = vpop.f32.mrf.mxu0 }
  0xe8   :  { %v116_v56 = vmax.f32 %v110_v52, 0.0 }
  0xe9   :  { %v112_v53 = vpop.f32.mrf.mxu0 }
  0xea   :  { %v113_v54 = vadd.f32 %v276_v49, %v112_v53 }
  0xeb   :  { %v308_v55 = vpop.f32.mrf.mxu0 }
  0xec   :  { %v117_v57 = vmax.f32 %v113_v54, 0.0 }
  0xee   :  { %v118_v58 = vpack.c.bf16 %v117_v57, %v116_v56 }
  0xf0   :  { %326 = vmatmul.mubr.bf16.vlgmr.msra.gmra.mxu1 %v118_v58 }
 0x1b0   :  { %v184_v6 = vpop.f32.mrf.mxu1 }
 0x1b1   :  { %v185_v8 = vadd.f32 %v278_v5, %v184_v6 }
 0x1b2   :  { %v327_v7 = vpop.f32.mrf.mxu1 }
 0x1b3   :  { %v191_v11 = vmax.f32 %v185_v8, 0.0 }
 0x1b4   :  { %v187_v9 = vpop.f32.mrf.mxu1 }
 0x1b5   :  { %v188_v10 = vadd.f32 %v278_v5, %v187_v9 }
 0x1b6   :  { %v328_v0 = vpop.f32.mrf.mxu1 }
 0x1b7   :  { %v192_v12 = vmax.f32 %v188_v10, 0.0 }
 0x1b9   :  { %v193_v13 = vpack.c.bf16 %v192_v12, %v191_v11 }
 0x1bb   :  { %346 = vmatmul.mubr.bf16.vlgmr.msra.gmra.mxu0 %v193_v13 }
 0x27b   :  { %v259_v15 = vpop.f32.mrf.mxu0 }
 0x27c   :  { %v260_v16 = vadd.f32 %v279_v14, %v259_v15 }
 0x27d   :  { %v347_v17 = vpop.f32.mrf.mxu0 }
 0x27e   :  { %267 = vst.msk [vmem:[%s593_s7] sm:$0xff] %vm266_vm2, %v260_v16 }
 0x27f   :  { %v262_v18 = vpop.f32.mrf.mxu0 }
 0x280   :  { %v263_v19 = vadd.f32 %v279_v14, %v262_v18 }
 0x281   :  { %v348_v20 = vpop.f32.mrf.mxu0 }
 0x282   :  { %269 = vst.msk [vmem:[%s593_s7 + $0x8] sm:$0x3] %vm268_vm3, %v263_v19 }
 0x283   :  { %274 = vsyncpa [#allocation3], 1 }
 0x284   :  { %275 = vsyncpa [#allocation5], 1 }

</bundles_post_ra>
